<compile_context>
chip_gen: v5e
topology: v5e:2x2
jax: 0.10.0
libtpu: 0.0.40
codegen_flags: <defaults>
</compile_context>

<pallas_src>
import functools
import math

import jax
import jax.numpy as jnp
from jax.experimental import pallas as pl
from jax.experimental.pallas import tpu as pltpu


_HALF_LOG_2PI = 0.5 * math.log(2.0 * math.pi)


# ------------------------------------------------------------------
# Special functions: fused digamma / lgamma with static recurrence shifts.
# ------------------------------------------------------------------
def _shift_poly_coeffs(k):
    """Coefficients (highest degree first) of p(x)=x(x+1)...(x+k-1) and p'(x)."""
    coeffs = [1.0]
    for j in range(k):
        nxt = [0.0] * (len(coeffs) + 1)
        for i, c in enumerate(coeffs):
            nxt[i] += c
            nxt[i + 1] += c * float(j)
        coeffs = nxt
    deg = len(coeffs) - 1
    dcoeffs = [c * float(deg - i) for i, c in enumerate(coeffs[:-1])]
    return coeffs, dcoeffs


def _horner(x, coeffs):
    if len(coeffs) == 1:
        return jnp.full(x.shape, coeffs[0], x.dtype)
    acc = (x + coeffs[1]) if coeffs[0] == 1.0 else (x * coeffs[0] + coeffs[1])
    for c in coeffs[2:]:
        acc = acc * x + c
    return acc


def _recip(y):
    """EUP approx reciprocal + one Newton step (cheaper than a full divide)."""
    r = pl.reciprocal(y, approx=True)
    return r * (2.0 - y * r)


def _digamma_series(log_y, inv_y):
    inv2 = inv_y * inv_y
    return (log_y - 0.5 * inv_y
            - inv2 * (1.0 / 12.0
                      - inv2 * (1.0 / 120.0
                                - inv2 * (1.0 / 252.0))))


def _lgamma_series(y, log_y, inv_y):
    return ((y - 0.5) * log_y - y + _HALF_LOG_2PI
            + inv_y * (1.0 / 12.0 - inv_y * inv_y * (1.0 / 360.0)))


def _digamma(x, shift):
    """psi(x) for x > 0 with x + shift >= 3 (truncation error < 1e-6)."""
    if shift > 0:
        p, dp = _shift_poly_coeffs(shift)
        corr = _horner(x, dp) * _recip(_horner(x, p))   # sum_j 1/(x+j), one recip
        y = x + float(shift)
    else:
        corr = None
        y = x
    log_y = jnp.log(y)
    inv_y = _recip(y)
    res = _digamma_series(log_y, inv_y)
    return res if corr is None else res - corr


def _digamma_lgamma(x, shift):
    """(psi(x), lgamma(x)) for x > 0 with x + shift >= 5; shares prod/log/recip."""
    if shift > 0:
        p, dp = _shift_poly_coeffs(shift)
        prod = _horner(x, p)
        corr = _horner(x, dp) * _recip(prod)
        log_prod = jnp.log(prod)
        y = x + float(shift)
    else:
        corr = log_prod = None
        y = x
    log_y = jnp.log(y)
    inv_y = _recip(y)
    dg = _digamma_series(log_y, inv_y)
    lg = _lgamma_series(y, log_y, inv_y)
    if shift > 0:
        dg = dg - corr
        lg = lg - log_prod
    return dg, lg


# ------------------------------------------------------------------
# Per-tile loss: (C, S, 128) evidence/targets -> (1, S, 128) loss (+ keep mask).
# ------------------------------------------------------------------
def _tile_loss(ev, tg, kl_coeff, cfg):
    c = ev.shape[0]

    # Bayes-risk cross-entropy term.
    alpha = ev + 1.0                                                  # >= 1
    s_sum = jnp.sum(alpha, axis=0, keepdims=True)                     # >= C
    dg_s = _digamma(s_sum, cfg["dg_shift_sum"])
    dg_a = _digamma(alpha, cfg["dg_shift_elem"])
    xent = jnp.sum(tg * (dg_s - dg_a), axis=0, keepdims=True)         # (1,S,128)

    # KL(Dir(alpha_kl) || Dir(1)) prior term (fused digamma+lgamma).
    alpha_kl = tg + (1.0 - tg) * alpha                                # >= 1
    akl_sum = jnp.sum(alpha_kl, axis=0, keepdims=True)                # >= C
    dg_akl, lg_akl = _digamma_lgamma(alpha_kl, cfg["dglg_shift_elem"])
    dg_aks, lg_aks = _digamma_lgamma(akl_sum, cfg["dglg_shift_sum"])
    kl = (lg_aks - cfg["lgamma_c"]
          - jnp.sum(lg_akl, axis=0, keepdims=True)
          + jnp.sum((alpha_kl - 1.0) * (dg_akl - dg_aks),
                    axis=0, keepdims=True))                           # (1,S,128)

    loss = xent + kl_coeff * kl

    keep = None
    ign = cfg["ignore_index"]
    if 0 <= ign < c:
        # torch.argmax picks the FIRST maximal class; reproduce with an
        # unrolled VPU comparison chain (no iota / no cross-lane reduce).
        max_tg = tg[0]
        for j in range(1, c):
            max_tg = jnp.maximum(max_tg, tg[j])
        is_ign = tg[ign] >= max_tg
        for j in range(ign):
            is_ign = jnp.logical_and(is_ign, tg[j] < max_tg)
        keep = jnp.logical_not(is_ign)[None]                          # (1,S,128)
    return loss, keep


def _lane_valid(cfg):
    """Validity mask for padded / phantom lanes (only built when needed)."""
    shp = (1, cfg["sub_tile"], 128)
    sub = jax.lax.broadcasted_iota(jnp.int32, shp, 1)
    lane = jax.lax.broadcasted_iota(jnp.int32, shp, 2)
    tile_idx = pl.program_id(1) * cfg["tiles_per_outer"] + pl.program_id(2)
    pix = (tile_idx * cfg["sub_tile"] + sub) * 128 + lane
    return pix < cfg["hw"]


# ------------------------------------------------------------------
# Kernels
# ------------------------------------------------------------------
def _mean_kernel(kl_ref, ev_ref, tg_ref, *out_refs, cfg):
    @pl.when(pl.program_id(2) == 0)
    def _init():
        for r in out_refs:
            r[...] = jnp.zeros_like(r)

    ev = ev_ref[...].astype(jnp.float32)   # (C, S, 128)
    tg = tg_ref[...].astype(jnp.float32)

    valid = None
    if cfg["needs_mask"]:
        valid = _lane_valid(cfg)
        ev = jnp.where(valid, ev, 0.0)     # keep masked math finite
        tg = jnp.where(valid, tg, 0.0)

    loss, keep = _tile_loss(ev, tg, kl_ref[0], cfg)

    if keep is not None:
        if valid is not None:
            keep = jnp.logical_and(keep, valid)
        msk = keep.astype(jnp.float32)
        out_refs[0][...] += (loss * msk)[0]
        out_refs[1][...] += msk[0]
    else:
        if valid is not None:
            loss = jnp.where(valid, loss, 0.0)
        out_refs[0][...] += loss[0]


def _pixel_kernel(kl_ref, ev_ref, tg_ref, out_ref, *, cfg):
    ev = ev_ref[...].astype(jnp.float32)
    tg = tg_ref[...].astype(jnp.float32)
    loss, keep = _tile_loss(ev, tg, kl_ref[0], cfg)
    if keep is not None:
        loss = loss * keep.astype(jnp.float32)
    out_ref[...] = loss[0]


# ------------------------------------------------------------------
# Tile-size / VMEM budgeting (per TPU generation).
# ------------------------------------------------------------------
def _vmem_budget():
    try:
        cap = int(pltpu.get_tpu_info().vmem_capacity_bytes)
    except Exception:
        cap = 64 * 1024 * 1024                       # conservative fallback
    budget = min(cap // 4, 24 * 1024 * 1024)          # inputs + in-kernel temps
    limit = max(min(cap // 2, 64 * 1024 * 1024), 32 * 1024 * 1024)
    return budget, limit


def _pick_sub_tile(n_cols, c, in_itemsize, budget_bytes):
    # Per 128-lane row of a block: 2 inputs x 2 pipeline buffers + ~10 f32
    # (C,row,128) temporaries in the body + a few (1,row,128) per-pixel slabs.
    per_row = (2 * 2 * in_itemsize + 10 * 4) * c * 128 + 8 * 4 * 128
    rows = max(8, int(budget_bytes // per_row))
    if n_cols <= rows:
        return n_cols                                  # full extent (allowed)
    return max(8, (rows // 8) * 8)


# ------------------------------------------------------------------
# Wrapper
# ------------------------------------------------------------------
def cross_entropy_bayes_risk_loss(evidence, targets, kl_div_coeff,
                                  reduction="mean", ignore_index=-100):
    """evidence/targets: (N, C, H, W); returns scalar (mean) or (N, H, W)."""
    n, c, h, w = evidence.shape
    assert targets.shape == evidence.shape
    hw = h * w
    n_cols = (hw + 127) // 128
    hw128 = n_cols * 128

    ev3 = evidence.reshape(n, c, hw)
    tg3 = targets.reshape(n, c, hw)
    if hw128 != hw:
        pad = hw128 - hw
        ev3 = jnp.pad(ev3, ((0, 0), (0, 0), (0, pad)))
        tg3 = jnp.pad(tg3, ((0, 0), (0, 0), (0, pad)))
    ev4 = ev3.reshape(n, c, n_cols, 128)
    tg4 = tg3.reshape(n, c, n_cols, 128)

    budget, vmem_limit = _vmem_budget()
    sub_tile = _pick_sub_tile(n_cols, c, jnp.dtype(evidence.dtype).itemsize,
                              budget)
    num_tiles = (n_cols + sub_tile - 1) // sub_tile

    track_mask = 0 <= int(ignore_index) < c
    cfg = dict(
        hw=hw,
        sub_tile=sub_tile,
        tiles_per_outer=num_tiles,
        needs_mask=False,
        ignore_index=int(ignore_index),
        lgamma_c=float(math.lgamma(c)),
        dg_shift_elem=2,                 # alpha    >= 1 -> reach >= 3
        dg_shift_sum=max(0, 3 - c),      # sums     >= C -> reach >= 3
        dglg_shift_elem=4,               # alpha_kl >= 1 -> reach >= 5
        dglg_shift_sum=max(0, 5 - c),    # akl_sum  >= C -> reach >= 5
    )

    # KL coefficient as an SMEM scalar operand: annealing it does not recompile.
    kl_arr = jnp.asarray(kl_div_coeff, dtype=jnp.float32).reshape((1,))
    smem_spec = pl.BlockSpec(memory_space=pltpu.MemorySpace.SMEM)

    if reduction == "mean":
        # Split the spatial axis when N == 1 so both v7x TensorCores get work.
        n_outer = 2 if (n == 1 and num_tiles >= 2) else 1
        tpo = (num_tiles + n_outer - 1) // n_outer
        covered = n_outer * tpo * sub_tile * 128
        cfg = dict(cfg, needs_mask=(covered != hw), tiles_per_outer=tpo)
        last_blk = num_tiles - 1

        def in_map(ni, oi, ii):
            # Clamp phantom inner steps to the last real block (their lanes
            # are fully masked in-kernel, so they contribute exactly zero).
            return (ni, 0, jnp.minimum(oi * tpo + ii, last_blk), 0)

        in_specs = [
            smem_spec,
            pl.BlockSpec((None, c, sub_tile, 128), in_map),
            pl.BlockSpec((None, c, sub_tile, 128), in_map),
        ]
        acc_spec = pl.BlockSpec((None, None, sub_tile, 128),
                                lambda ni, oi, ii: (ni, oi, 0, 0))
        acc_shape = jax.ShapeDtypeStruct((n, n_outer, sub_tile, 128),
                                         jnp.float32)
        n_out = 2 if track_mask else 1

        outs = pl.pallas_call(
            functools.partial(_mean_kernel, cfg=cfg),
            out_shape=tuple([acc_shape] * n_out),
            grid_spec=pltpu.PrefetchScalarGridSpec(
                num_scalar_prefetch=0,
                grid=(n, n_outer, tpo),
                in_specs=in_specs,
                out_specs=[acc_spec] * n_out),
            compiler_params=pltpu.CompilerParams(
                dimension_semantics=("parallel", "parallel", "arbitrary"),
                vmem_limit_bytes=vmem_limit),
        )(kl_arr, ev4, tg4)

        loss_sum = jnp.sum(outs[0])
        if track_mask:
            # Matches torch: divides by msk.sum() even when it is zero.
            return loss_sum / jnp.sum(outs[1])
        return loss_sum / float(n * hw)

    # reduction != 'mean' -> per-pixel (masked) loss of shape (N, H, W).
    in_specs = [
        smem_spec,
        pl.BlockSpec((None, c, sub_tile, 128), lambda ni, ti: (ni, 0, ti, 0)),
        pl.BlockSpec((None, c, sub_tile, 128), lambda ni, ti: (ni, 0, ti, 0)),
    ]
    loss = pl.pallas_call(
        functools.partial(_pixel_kernel, cfg=cfg),
        out_shape=jax.ShapeDtypeStruct((n, n_cols, 128), jnp.float32),
        grid_spec=pltpu.PrefetchScalarGridSpec(
            num_scalar_prefetch=0,
            grid=(n, num_tiles),
            in_specs=in_specs,
            out_specs=pl.BlockSpec((None, sub_tile, 128),
                                   lambda ni, ti: (ni, ti, 0))),
        compiler_params=pltpu.CompilerParams(
            dimension_semantics=("parallel", "parallel"),
            vmem_limit_bytes=vmem_limit),
    )(kl_arr, ev4, tg4)

    loss = loss.reshape(n, hw128)
    if hw128 != hw:
        loss = loss[:, :hw]
    return loss.reshape(n, h, w)


# ------------------------------------------------------------------
# Pure-JAX reference (sanity check only)
# ------------------------------------------------------------------
def _reference_loss(evidence, targets, kl_div_coeff, ignore_index=-100,
                    reduction="mean"):
    from jax.scipy.special import digamma, gammaln
    alpha = evidence + 1.0
    s = alpha.sum(axis=1, keepdims=True)
    xent = (targets * (digamma(s) - digamma(alpha))).sum(axis=1)
    alpha_kl = targets + (1.0 - targets) * alpha
    akl_sum = alpha_kl.sum(axis=1, keepdims=True)
    ones_sum = jnp.ones_like(alpha).sum(axis=1, keepdims=True)
    kl_log = (gammaln(akl_sum) - gammaln(ones_sum)
              - gammaln(alpha_kl).sum(axis=1, keepdims=True))
    kl_dig = ((alpha_kl - 1.0) * (digamma(alpha_kl) - digamma(akl_sum))
              ).sum(axis=1, keepdims=True)
    kl = (kl_log + kl_dig).squeeze(axis=1)
    tidx = jnp.argmax(targets, axis=1)
    msk = (tidx != ignore_index).astype(jnp.float32)
    loss = (xent + kl_div_coeff * kl) * msk
    if reduction == "mean":
        return loss.sum() / msk.sum()
    return loss


if __name__ == "__main__":
    key = jax.random.PRNGKey(0)
    k_ev, k_lbl, k_ev2, k_lbl2 = jax.random.split(key, 4)

    N, C, H, W = 2, 4, 16, 16
    # Non-negative evidence (as produced by e.g. softplus/exp heads).
    evidence = jnp.exp(0.5 * jax.random.normal(k_ev, (N, C, H, W),
                                               dtype=jnp.float32))
    labels = jax.random.randint(k_lbl, (N, H, W), 0, C)
    targets = jax.nn.one_hot(labels, C, axis=1, dtype=jnp.float32)
    kl_div_coeff = 0.1

    # mean reduction
    loss = cross_entropy_bayes_risk_loss(evidence, targets, kl_div_coeff)
    loss = jax.block_until_ready(loss)
    ref = _reference_loss(evidence, targets, kl_div_coeff)
    assert jnp.isfinite(loss), "kernel produced non-finite loss"
    assert jnp.allclose(loss, ref, rtol=1e-3, atol=1e-3), (loss, ref)

    # unreduced (per-pixel) path
    loss_px = cross_entropy_bayes_risk_loss(evidence, targets, kl_div_coeff,
                                            reduction="none")
    loss_px = jax.block_until_ready(loss_px)
    ref_px = _reference_loss(evidence, targets, kl_div_coeff, reduction="none")
    assert loss_px.shape == (N, H, W)
    assert jnp.allclose(loss_px, ref_px, rtol=1e-3, atol=1e-3), "pixel mismatch"

    # ignore_index active (mean path with mask accumulator)
    loss_ig = cross_entropy_bayes_risk_loss(evidence, targets, kl_div_coeff,
                                            ignore_index=0)
    loss_ig = jax.block_until_ready(loss_ig)
    ref_ig = _reference_loss(evidence, targets, kl_div_coeff, ignore_index=0)
    assert jnp.allclose(loss_ig, ref_ig, rtol=1e-3, atol=1e-3), (loss_ig, ref_ig)

    # Ragged spatial size: exercises the 128-pad + in-kernel validity mask.
    H2, W2 = 10, 9
    evidence2 = jnp.exp(0.5 * jax.random.normal(k_ev2, (1, C, H2, W2),
                                                dtype=jnp.float32))
    labels2 = jax.random.randint(k_lbl2, (1, H2, W2), 0, C)
    targets2 = jax.nn.one_hot(labels2, C, axis=1, dtype=jnp.float32)
    loss2 = jax.block_until_ready(
        cross_entropy_bayes_risk_loss(evidence2, targets2, 0.25))
    ref2 = _reference_loss(evidence2, targets2, 0.25)
    assert jnp.allclose(loss2, ref2, rtol=1e-3, atol=1e-3), (loss2, ref2)
    loss2_px = jax.block_until_ready(
        cross_entropy_bayes_risk_loss(evidence2, targets2, 0.25,
                                      reduction="none"))
    ref2_px = _reference_loss(evidence2, targets2, 0.25, reduction="none")
    assert loss2_px.shape == (1, H2, W2)
    assert jnp.allclose(loss2_px, ref2_px, rtol=1e-3, atol=1e-3)

    print("KERNEL_OK")
</pallas_src>

<mosaic_0001>
module attributes {stable_mosaic.version = 11 : i64} {
  func.func @_mean_kernel(%arg0: i32, %arg1: i32, %arg2: i32, %arg3: memref<1xf32, #tpu.memory_space<smem>>, %arg4: memref<1x4x2x128xf32, #tpu.memory_space<vmem>>, %arg5: memref<1x4x2x128xf32, #tpu.memory_space<vmem>>, %arg6: memref<1x1x2x128xf32, #tpu.memory_space<vmem>>) attributes {dimension_semantics = [#tpu.dimension_semantics<parallel>, #tpu.dimension_semantics<parallel>, #tpu.dimension_semantics<arbitrary>], iteration_bounds = array<i64: 2, 1, 1>, scalar_prefetch = 0 : i64, scratch_operands = 0 : i64, tpu.core_type = #tpu.core_type<tc>, window_params = [{transform_indices = @transform_0, window_bounds = array<i64: 1>}, {transform_indices = @transform_1, window_bounds = array<i64: 1, 4, 2, 128>}, {transform_indices = @transform_2, window_bounds = array<i64: 1, 4, 2, 128>}, {transform_indices = @transform_3, window_bounds = array<i64: 1, 1, 2, 128>}]} {
    %c0_i32 = arith.constant 0 : i32
    %0 = arith.cmpi eq, %arg2, %c0_i32 : i32
    %1 = arith.extui %0 : i1 to i32
    %c0_i32_0 = arith.constant 0 : i32
    %2 = arith.cmpi ne, %1, %c0_i32_0 : i32
    scf.if %2 {
      %cst_73 = arith.constant 0.000000e+00 : f32
      %212 = vector.broadcast %cst_73 : f32 to vector<2x128xf32>
      %c0_74 = arith.constant 0 : index
      %c0_75 = arith.constant 0 : index
      %c0_76 = arith.constant 0 : index
      %c0_77 = arith.constant 0 : index
      %213 = vector.load %arg6[%c0_74, %c0_75, %c0_76, %c0_77] : memref<1x1x2x128xf32, #tpu.memory_space<vmem>>, vector<1x1x2x128xf32>
      %214 = vector.shape_cast %213 : vector<1x1x2x128xf32> to vector<2x128xf32>
      %215 = vector.shape_cast %212 : vector<2x128xf32> to vector<1x1x2x128xf32>
      tpu.vector_store %arg6[%c0_74, %c0_75, %c0_76, %c0_77], %215 {strides = array<i32>} : memref<1x1x2x128xf32, #tpu.memory_space<vmem>>, vector<1x1x2x128xf32>,
    } else {
    }
    %c0 = arith.constant 0 : index
    %c0_1 = arith.constant 0 : index
    %c0_2 = arith.constant 0 : index
    %c0_3 = arith.constant 0 : index
    %3 = vector.load %arg4[%c0, %c0_1, %c0_2, %c0_3] : memref<1x4x2x128xf32, #tpu.memory_space<vmem>>, vector<1x4x2x128xf32>
    %4 = vector.shape_cast %3 : vector<1x4x2x128xf32> to vector<4x2x128xf32>
    %c0_4 = arith.constant 0 : index
    %c0_5 = arith.constant 0 : index
    %c0_6 = arith.constant 0 : index
    %c0_7 = arith.constant 0 : index
    %5 = vector.load %arg5[%c0_4, %c0_5, %c0_6, %c0_7] : memref<1x4x2x128xf32, #tpu.memory_space<vmem>>, vector<1x4x2x128xf32>
    %6 = vector.shape_cast %5 : vector<1x4x2x128xf32> to vector<4x2x128xf32>
    %c0_8 = arith.constant 0 : index
    %7 = memref.load %arg3[%c0_8] : memref<1xf32, #tpu.memory_space<smem>>
    %cst = arith.constant 1.000000e+00 : f32
    %8 = vector.broadcast %cst : f32 to vector<4x2x128xf32>
    %9 = arith.addf %4, %8 : vector<4x2x128xf32>
    %cst_9 = arith.constant dense<0.000000e+00> : vector<2x128xf32>
    %10 = vector.multi_reduction <add>, %9, %cst_9 [0] : vector<4x2x128xf32> to vector<2x128xf32>
    %11 = vector.shape_cast %10 : vector<2x128xf32> to vector<1x2x128xf32>
    %12 = math.log %11 : vector<1x2x128xf32>
    %13 = tpu.reciprocal %11 {approx = true} : vector<1x2x128xf32> -> vector<1x2x128xf32>
    %14 = arith.mulf %11, %13 : vector<1x2x128xf32>
    %cst_10 = arith.constant 2.000000e+00 : f32
    %15 = vector.broadcast %cst_10 : f32 to vector<1x2x128xf32>
    %16 = arith.subf %15, %14 : vector<1x2x128xf32>
    %17 = arith.mulf %13, %16 : vector<1x2x128xf32>
    %18 = arith.mulf %17, %17 : vector<1x2x128xf32>
    %cst_11 = arith.constant 5.000000e-01 : f32
    %19 = vector.broadcast %cst_11 : f32 to vector<1x2x128xf32>
    %20 = arith.mulf %19, %17 : vector<1x2x128xf32>
    %21 = arith.subf %12, %20 : vector<1x2x128xf32>
    %cst_12 = arith.constant 0.0039682542 : f32
    %22 = vector.broadcast %cst_12 : f32 to vector<1x2x128xf32>
    %23 = arith.mulf %18, %22 : vector<1x2x128xf32>
    %cst_13 = arith.constant 0.00833333377 : f32
    %24 = vector.broadcast %cst_13 : f32 to vector<1x2x128xf32>
    %25 = arith.subf %24, %23 : vector<1x2x128xf32>
    %26 = arith.mulf %18, %25 : vector<1x2x128xf32>
    %cst_14 = arith.constant 0.0833333358 : f32
    %27 = vector.broadcast %cst_14 : f32 to vector<1x2x128xf32>
    %28 = arith.subf %27, %26 : vector<1x2x128xf32>
    %29 = arith.mulf %18, %28 : vector<1x2x128xf32>
    %30 = arith.subf %21, %29 : vector<1x2x128xf32>
    %cst_15 = arith.constant 2.000000e+00 : f32
    %31 = vector.broadcast %cst_15 : f32 to vector<4x2x128xf32>
    %32 = arith.mulf %9, %31 : vector<4x2x128xf32>
    %cst_16 = arith.constant 1.000000e+00 : f32
    %33 = vector.broadcast %cst_16 : f32 to vector<4x2x128xf32>
    %34 = arith.addf %32, %33 : vector<4x2x128xf32>
    %cst_17 = arith.constant 1.000000e+00 : f32
    %35 = vector.broadcast %cst_17 : f32 to vector<4x2x128xf32>
    %36 = arith.addf %9, %35 : vector<4x2x128xf32>
    %37 = arith.mulf %36, %9 : vector<4x2x128xf32>
    %cst_18 = arith.constant 0.000000e+00 : f32
    %38 = vector.broadcast %cst_18 : f32 to vector<4x2x128xf32>
    %39 = arith.addf %37, %38 : vector<4x2x128xf32>
    %40 = tpu.reciprocal %39 {approx = true} : vector<4x2x128xf32> -> vector<4x2x128xf32>
    %41 = arith.mulf %39, %40 : vector<4x2x128xf32>
    %cst_19 = arith.constant 2.000000e+00 : f32
    %42 = vector.broadcast %cst_19 : f32 to vector<4x2x128xf32>
    %43 = arith.subf %42, %41 : vector<4x2x128xf32>
    %44 = arith.mulf %40, %43 : vector<4x2x128xf32>
    %45 = arith.mulf %34, %44 : vector<4x2x128xf32>
    %cst_20 = arith.constant 2.000000e+00 : f32
    %46 = vector.broadcast %cst_20 : f32 to vector<4x2x128xf32>
    %47 = arith.addf %9, %46 : vector<4x2x128xf32>
    %48 = math.log %47 : vector<4x2x128xf32>
    %49 = tpu.reciprocal %47 {approx = true} : vector<4x2x128xf32> -> vector<4x2x128xf32>
    %50 = arith.mulf %47, %49 : vector<4x2x128xf32>
    %cst_21 = arith.constant 2.000000e+00 : f32
    %51 = vector.broadcast %cst_21 : f32 to vector<4x2x128xf32>
    %52 = arith.subf %51, %50 : vector<4x2x128xf32>
    %53 = arith.mulf %49, %52 : vector<4x2x128xf32>
    %54 = arith.mulf %53, %53 : vector<4x2x128xf32>
    %cst_22 = arith.constant 5.000000e-01 : f32
    %55 = vector.broadcast %cst_22 : f32 to vector<4x2x128xf32>
    %56 = arith.mulf %55, %53 : vector<4x2x128xf32>
    %57 = arith.subf %48, %56 : vector<4x2x128xf32>
    %cst_23 = arith.constant 0.0039682542 : f32
    %58 = vector.broadcast %cst_23 : f32 to vector<4x2x128xf32>
    %59 = arith.mulf %54, %58 : vector<4x2x128xf32>
    %cst_24 = arith.constant 0.00833333377 : f32
    %60 = vector.broadcast %cst_24 : f32 to vector<4x2x128xf32>
    %61 = arith.subf %60, %59 : vector<4x2x128xf32>
    %62 = arith.mulf %54, %61 : vector<4x2x128xf32>
    %cst_25 = arith.constant 0.0833333358 : f32
    %63 = vector.broadcast %cst_25 : f32 to vector<4x2x128xf32>
    %64 = arith.subf %63, %62 : vector<4x2x128xf32>
    %65 = arith.mulf %54, %64 : vector<4x2x128xf32>
    %66 = arith.subf %57, %65 : vector<4x2x128xf32>
    %67 = arith.subf %66, %45 : vector<4x2x128xf32>
    %68 = vector.broadcast %30 : vector<1x2x128xf32> to vector<4x2x128xf32>
    %69 = arith.subf %68, %67 : vector<4x2x128xf32>
    %70 = arith.mulf %6, %69 : vector<4x2x128xf32>
    %cst_26 = arith.constant dense<0.000000e+00> : vector<2x128xf32>
    %71 = vector.multi_reduction <add>, %70, %cst_26 [0] : vector<4x2x128xf32> to vector<2x128xf32>
    %72 = vector.shape_cast %71 : vector<2x128xf32> to vector<1x2x128xf32>
    %cst_27 = arith.constant 1.000000e+00 : f32
    %73 = vector.broadcast %cst_27 : f32 to vector<4x2x128xf32>
    %74 = arith.subf %73, %6 : vector<4x2x128xf32>
    %75 = arith.mulf %74, %9 : vector<4x2x128xf32>
    %76 = arith.addf %6, %75 : vector<4x2x128xf32>
    %cst_28 = arith.constant dense<0.000000e+00> : vector<2x128xf32>
    %77 = vector.multi_reduction <add>, %76, %cst_28 [0] : vector<4x2x128xf32> to vector<2x128xf32>
    %78 = vector.shape_cast %77 : vector<2x128xf32> to vector<1x2x128xf32>
    %cst_29 = arith.constant 6.000000e+00 : f32
    %79 = vector.broadcast %cst_29 : f32 to vector<4x2x128xf32>
    %80 = arith.addf %76, %79 : vector<4x2x128xf32>
    %81 = arith.mulf %80, %76 : vector<4x2x128xf32>
    %cst_30 = arith.constant 1.100000e+01 : f32
    %82 = vector.broadcast %cst_30 : f32 to vector<4x2x128xf32>
    %83 = arith.addf %81, %82 : vector<4x2x128xf32>
    %84 = arith.mulf %83, %76 : vector<4x2x128xf32>
    %cst_31 = arith.constant 6.000000e+00 : f32
    %85 = vector.broadcast %cst_31 : f32 to vector<4x2x128xf32>
    %86 = arith.addf %84, %85 : vector<4x2x128xf32>
    %87 = arith.mulf %86, %76 : vector<4x2x128xf32>
    %cst_32 = arith.constant 0.000000e+00 : f32
    %88 = vector.broadcast %cst_32 : f32 to vector<4x2x128xf32>
    %89 = arith.addf %87, %88 : vector<4x2x128xf32>
    %cst_33 = arith.constant 4.000000e+00 : f32
    %90 = vector.broadcast %cst_33 : f32 to vector<4x2x128xf32>
    %91 = arith.mulf %76, %90 : vector<4x2x128xf32>
    %cst_34 = arith.constant 1.800000e+01 : f32
    %92 = vector.broadcast %cst_34 : f32 to vector<4x2x128xf32>
    %93 = arith.addf %91, %92 : vector<4x2x128xf32>
    %94 = arith.mulf %93, %76 : vector<4x2x128xf32>
    %cst_35 = arith.constant 2.200000e+01 : f32
    %95 = vector.broadcast %cst_35 : f32 to vector<4x2x128xf32>
    %96 = arith.addf %94, %95 : vector<4x2x128xf32>
    %97 = arith.mulf %96, %76 : vector<4x2x128xf32>
    %cst_36 = arith.constant 6.000000e+00 : f32
    %98 = vector.broadcast %cst_36 : f32 to vector<4x2x128xf32>
    %99 = arith.addf %97, %98 : vector<4x2x128xf32>
    %100 = tpu.reciprocal %89 {approx = true} : vector<4x2x128xf32> -> vector<4x2x128xf32>
    %101 = arith.mulf %89, %100 : vector<4x2x128xf32>
    %cst_37 = arith.constant 2.000000e+00 : f32
    %102 = vector.broadcast %cst_37 : f32 to vector<4x2x128xf32>
    %103 = arith.subf %102, %101 : vector<4x2x128xf32>
    %104 = arith.mulf %100, %103 : vector<4x2x128xf32>
    %105 = arith.mulf %99, %104 : vector<4x2x128xf32>
    %106 = math.log %89 : vector<4x2x128xf32>
    %cst_38 = arith.constant 4.000000e+00 : f32
    %107 = vector.broadcast %cst_38 : f32 to vector<4x2x128xf32>
    %108 = arith.addf %76, %107 : vector<4x2x128xf32>
    %109 = math.log %108 : vector<4x2x128xf32>
    %110 = tpu.reciprocal %108 {approx = true} : vector<4x2x128xf32> -> vector<4x2x128xf32>
    %111 = arith.mulf %108, %110 : vector<4x2x128xf32>
    %cst_39 = arith.constant 2.000000e+00 : f32
    %112 = vector.broadcast %cst_39 : f32 to vector<4x2x128xf32>
    %113 = arith.subf %112, %111 : vector<4x2x128xf32>
    %114 = arith.mulf %110, %113 : vector<4x2x128xf32>
    %115 = arith.mulf %114, %114 : vector<4x2x128xf32>
    %cst_40 = arith.constant 5.000000e-01 : f32
    %116 = vector.broadcast %cst_40 : f32 to vector<4x2x128xf32>
    %117 = arith.mulf %116, %114 : vector<4x2x128xf32>
    %118 = arith.subf %109, %117 : vector<4x2x128xf32>
    %cst_41 = arith.constant 0.0039682542 : f32
    %119 = vector.broadcast %cst_41 : f32 to vector<4x2x128xf32>
    %120 = arith.mulf %115, %119 : vector<4x2x128xf32>
    %cst_42 = arith.constant 0.00833333377 : f32
    %121 = vector.broadcast %cst_42 : f32 to vector<4x2x128xf32>
    %122 = arith.subf %121, %120 : vector<4x2x128xf32>
    %123 = arith.mulf %115, %122 : vector<4x2x128xf32>
    %cst_43 = arith.constant 0.0833333358 : f32
    %124 = vector.broadcast %cst_43 : f32 to vector<4x2x128xf32>
    %125 = arith.subf %124, %123 : vector<4x2x128xf32>
    %126 = arith.mulf %115, %125 : vector<4x2x128xf32>
    %127 = arith.subf %118, %126 : vector<4x2x128xf32>
    %cst_44 = arith.constant 5.000000e-01 : f32
    %128 = vector.broadcast %cst_44 : f32 to vector<4x2x128xf32>
    %129 = arith.subf %108, %128 : vector<4x2x128xf32>
    %130 = arith.mulf %129, %109 : vector<4x2x128xf32>
    %131 = arith.subf %130, %108 : vector<4x2x128xf32>
    %cst_45 = arith.constant 0.918938517 : f32
    %132 = vector.broadcast %cst_45 : f32 to vector<4x2x128xf32>
    %133 = arith.addf %131, %132 : vector<4x2x128xf32>
    %134 = arith.mulf %114, %114 : vector<4x2x128xf32>
    %cst_46 = arith.constant 0.00277777785 : f32
    %135 = vector.broadcast %cst_46 : f32 to vector<4x2x128xf32>
    %136 = arith.mulf %134, %135 : vector<4x2x128xf32>
    %cst_47 = arith.constant 0.0833333358 : f32
    %137 = vector.broadcast %cst_47 : f32 to vector<4x2x128xf32>
    %138 = arith.subf %137, %136 : vector<4x2x128xf32>
    %139 = arith.mulf %114, %138 : vector<4x2x128xf32>
    %140 = arith.addf %133, %139 : vector<4x2x128xf32>
    %141 = arith.subf %127, %105 : vector<4x2x128xf32>
    %142 = arith.subf %140, %106 : vector<4x2x128xf32>
    %cst_48 = arith.constant 0.000000e+00 : f32
    %143 = vector.broadcast %cst_48 : f32 to vector<1x2x128xf32>
    %144 = arith.addf %78, %143 : vector<1x2x128xf32>
    %cst_49 = arith.constant 1.000000e+00 : f32
    %145 = vector.broadcast %cst_49 : f32 to vector<1x2x128xf32>
    %146 = tpu.reciprocal %144 {approx = true} : vector<1x2x128xf32> -> vector<1x2x128xf32>
    %147 = arith.mulf %144, %146 : vector<1x2x128xf32>
    %cst_50 = arith.constant 2.000000e+00 : f32
    %148 = vector.broadcast %cst_50 : f32 to vector<1x2x128xf32>
    %149 = arith.subf %148, %147 : vector<1x2x128xf32>
    %150 = arith.mulf %146, %149 : vector<1x2x128xf32>
    %151 = arith.mulf %145, %150 : vector<1x2x128xf32>
    %152 = math.log %144 : vector<1x2x128xf32>
    %cst_51 = arith.constant 1.000000e+00 : f32
    %153 = vector.broadcast %cst_51 : f32 to vector<1x2x128xf32>
    %154 = arith.addf %78, %153 : vector<1x2x128xf32>
    %155 = math.log %154 : vector<1x2x128xf32>
    %156 = tpu.reciprocal %154 {approx = true} : vector<1x2x128xf32> -> vector<1x2x128xf32>
    %157 = arith.mulf %154, %156 : vector<1x2x128xf32>
    %cst_52 = arith.constant 2.000000e+00 : f32
    %158 = vector.broadcast %cst_52 : f32 to vector<1x2x128xf32>
    %159 = arith.subf %158, %157 : vector<1x2x128xf32>
    %160 = arith.mulf %156, %159 : vector<1x2x128xf32>
    %161 = arith.mulf %160, %160 : vector<1x2x128xf32>
    %cst_53 = arith.constant 5.000000e-01 : f32
    %162 = vector.broadcast %cst_53 : f32 to vector<1x2x128xf32>
    %163 = arith.mulf %162, %160 : vector<1x2x128xf32>
    %164 = arith.subf %155, %163 : vector<1x2x128xf32>
    %cst_54 = arith.constant 0.0039682542 : f32
    %165 = vector.broadcast %cst_54 : f32 to vector<1x2x128xf32>
    %166 = arith.mulf %161, %165 : vector<1x2x128xf32>
    %cst_55 = arith.constant 0.00833333377 : f32
    %167 = vector.broadcast %cst_55 : f32 to vector<1x2x128xf32>
    %168 = arith.subf %167, %166 : vector<1x2x128xf32>
    %169 = arith.mulf %161, %168 : vector<1x2x128xf32>
    %cst_56 = arith.constant 0.0833333358 : f32
    %170 = vector.broadcast %cst_56 : f32 to vector<1x2x128xf32>
    %171 = arith.subf %170, %169 : vector<1x2x128xf32>
    %172 = arith.mulf %161, %171 : vector<1x2x128xf32>
    %173 = arith.subf %164, %172 : vector<1x2x128xf32>
    %cst_57 = arith.constant 5.000000e-01 : f32
    %174 = vector.broadcast %cst_57 : f32 to vector<1x2x128xf32>
    %175 = arith.subf %154, %174 : vector<1x2x128xf32>
    %176 = arith.mulf %175, %155 : vector<1x2x128xf32>
    %177 = arith.subf %176, %154 : vector<1x2x128xf32>
    %cst_58 = arith.constant 0.918938517 : f32
    %178 = vector.broadcast %cst_58 : f32 to vector<1x2x128xf32>
    %179 = arith.addf %177, %178 : vector<1x2x128xf32>
    %180 = arith.mulf %160, %160 : vector<1x2x128xf32>
    %cst_59 = arith.constant 0.00277777785 : f32
    %181 = vector.broadcast %cst_59 : f32 to vector<1x2x128xf32>
    %182 = arith.mulf %180, %181 : vector<1x2x128xf32>
    %cst_60 = arith.constant 0.0833333358 : f32
    %183 = vector.broadcast %cst_60 : f32 to vector<1x2x128xf32>
    %184 = arith.subf %183, %182 : vector<1x2x128xf32>
    %185 = arith.mulf %160, %184 : vector<1x2x128xf32>
    %186 = arith.addf %179, %185 : vector<1x2x128xf32>
    %187 = arith.subf %173, %151 : vector<1x2x128xf32>
    %188 = arith.subf %186, %152 : vector<1x2x128xf32>
    %cst_61 = arith.constant 1.79175949 : f32
    %189 = vector.broadcast %cst_61 : f32 to vector<1x2x128xf32>
    %190 = arith.subf %188, %189 : vector<1x2x128xf32>
    %cst_62 = arith.constant dense<0.000000e+00> : vector<2x128xf32>
    %191 = vector.multi_reduction <add>, %142, %cst_62 [0] : vector<4x2x128xf32> to vector<2x128xf32>
    %192 = vector.shape_cast %191 : vector<2x128xf32> to vector<1x2x128xf32>
    %193 = arith.subf %190, %192 : vector<1x2x128xf32>
    %cst_63 = arith.constant 1.000000e+00 : f32
    %194 = vector.broadcast %cst_63 : f32 to vector<4x2x128xf32>
    %195 = arith.subf %76, %194 : vector<4x2x128xf32>
    %196 = vector.broadcast %187 : vector<1x2x128xf32> to vector<4x2x128xf32>
    %197 = arith.subf %141, %196 : vector<4x2x128xf32>
    %198 = arith.mulf %195, %197 : vector<4x2x128xf32>
    %cst_64 = arith.constant dense<0.000000e+00> : vector<2x128xf32>
    %199 = vector.multi_reduction <add>, %198, %cst_64 [0] : vector<4x2x128xf32> to vector<2x128xf32>
    %200 = vector.shape_cast %199 : vector<2x128xf32> to vector<1x2x128xf32>
    %201 = arith.addf %193, %200 : vector<1x2x128xf32>
    %202 = vector.broadcast %7 : f32 to vector<1x2x128xf32>
    %203 = arith.mulf %202, %201 : vector<1x2x128xf32>
    %204 = arith.addf %72, %203 : vector<1x2x128xf32>
    %c0_65 = arith.constant 0 : index
    %c0_66 = arith.constant 0 : index
    %c0_67 = arith.constant 0 : index
    %c0_68 = arith.constant 0 : index
    %205 = vector.load %arg6[%c0_65, %c0_66, %c0_67, %c0_68] : memref<1x1x2x128xf32, #tpu.memory_space<vmem>>, vector<1x1x2x128xf32>
    %206 = vector.shape_cast %205 : vector<1x1x2x128xf32> to vector<2x128xf32>
    %207 = vector.shape_cast %204 : vector<1x2x128xf32> to vector<2x128xf32>
    %208 = arith.addf %206, %207 : vector<2x128xf32>
    %c0_69 = arith.constant 0 : index
    %c0_70 = arith.constant 0 : index
    %c0_71 = arith.constant 0 : index
    %c0_72 = arith.constant 0 : index
    %209 = vector.load %arg6[%c0_69, %c0_70, %c0_71, %c0_72] : memref<1x1x2x128xf32, #tpu.memory_space<vmem>>, vector<1x1x2x128xf32>
    %210 = vector.shape_cast %209 : vector<1x1x2x128xf32> to vector<2x128xf32>
    %211 = vector.shape_cast %208 : vector<2x128xf32> to vector<1x1x2x128xf32>
    tpu.vector_store %arg6[%c0_69, %c0_70, %c0_71, %c0_72], %211 {strides = array<i32>} : memref<1x1x2x128xf32, #tpu.memory_space<vmem>>, vector<1x1x2x128xf32>,
    return
  }
  func.func @transform_0(%arg0: i32, %arg1: i32, %arg2: i32) -> i32 {
    %c0_i32 = arith.constant 0 : i32
    %c0_i32_0 = arith.constant 0 : i32
    return %c0_i32 : i32
  }
  func.func @transform_1(%arg0: i32, %arg1: i32, %arg2: i32) -> (i32, i32, i32, i32) {
    %c1_i32 = arith.constant 1 : i32
    %0 = arith.muli %arg1, %c1_i32 : i32
    %1 = arith.addi %0, %arg2 : i32
    %c0_i32 = arith.constant 0 : i32
    %2 = arith.minsi %1, %c0_i32 : i32
    %c0_i32_0 = arith.constant 0 : i32
    %c0_i32_1 = arith.constant 0 : i32
    %c0_i32_2 = arith.constant 0 : i32
    return %arg0, %c0_i32_0, %2, %c0_i32_1 : i32, i32, i32, i32
  }
  func.func @transform_2(%arg0: i32, %arg1: i32, %arg2: i32) -> (i32, i32, i32, i32) {
    %c1_i32 = arith.constant 1 : i32
    %0 = arith.muli %arg1, %c1_i32 : i32
    %1 = arith.addi %0, %arg2 : i32
    %c0_i32 = arith.constant 0 : i32
    %2 = arith.minsi %1, %c0_i32 : i32
    %c0_i32_0 = arith.constant 0 : i32
    %c0_i32_1 = arith.constant 0 : i32
    %c0_i32_2 = arith.constant 0 : i32
    return %arg0, %c0_i32_0, %2, %c0_i32_1 : i32, i32, i32, i32
  }
  func.func @transform_3(%arg0: i32, %arg1: i32, %arg2: i32) -> (i32, i32, i32, i32) {
    %c0_i32 = arith.constant 0 : i32
    %c0_i32_0 = arith.constant 0 : i32
    %c0_i32_1 = arith.constant 0 : i32
    return %arg0, %arg1, %c0_i32, %c0_i32_0 : i32, i32, i32, i32
  }
}

</mosaic_0001>

<bundles_post_ra>
// kernel: tpu_custom_call.1
= control target key start
LH: loop header
LB: loop body
LE: loop exit
PB: predicated region body
PF: predicated region fallthrough
CT: control target
= control target key end

     0   :  { %s1754_s0 = inlined_call_operand.<no memory space> [shape: f32[1], index: 0, kind: input, shape index: {}]   ;;  %s1755_s1 = inlined_call_operand.hbm [shape: f32[2,4,2,128], index: 1, kind: input, shape index: {}]   ;;  %s1756_s2 = inlined_call_operand.hbm [shape: f32[2,4,2,128], index: 2, kind: input, shape index: {}]   ;;  %s1757_s3 = inlined_call_operand.hbm [shape: f32[2,1,2,128], index: 3, kind: output, shape index: {}]  }
   0x1   :  { %8 = sst [smem:[#allocation2]] %s1754_s0 }
   0x2   :  { %9 = vsyncpa [#allocation4], 0 }
   0x3   :  { %11 = vsyncpa [#allocation4 + $0x1], 0 }
   0x4   :  { %12 = vsyncpa [#allocation7], 0 }
   0x5   :  { %14 = vsyncpa [#allocation7 + $0x1], 0 }
   0x6   :  { %15 = vsyncpa [#allocation5], 0 }
   0x7   :  { %17 = vsyncpa [#allocation5 + $0x1], 0  ;;  %s1188_s14 = smov 0   ;;  %s1190_s15 = smov 0  }
   0x8   :  { %s1192_s16 = smov 0   ;;  %s1194_s17 = smov 0  }
   0x9   :  { %s1196_s18 = smov 0   ;;  %s1198_s19 = smov 0  }
   0xa LB: > { %s846_s0 = sadd.s32 4294967295, %s1160_s19   ;;  %s847_s20 = sadd.s32 4294967294, %s1160_s19   ;;  %s1160_s19 = sphi %s1198_s19, %s23_s19   ;;  %s1156_s18 = sphi %s1196_s18, %s1790_s18   ;;  %s1152_s17 = sphi %s1194_s17, %s1789_s17   ;;  %s1148_s16 = sphi %s1192_s16, %s1788_s16   ;;  %s1144_s15 = sphi %s1190_s15, %s1787_s15   ;;  %s1140_s14 = sphi %s1188_s14, %s1786_s14  }
   0xb   : > { %s42_s21 = sadd.s32 1, %s1156_s18  ;;  %s78_s22 = sadd.s32 1, %s1148_s16 }
   0xc   : > { %p44_p0 = scmp.ge.s32.totalorder %s42_s21, 2  ;;  %p85_p1 = scmp.ne.s32.totalorder %s1148_s16, %s1144_s15 }
   0xd   : > { %p86_p2 = scmp.eq.s32.totalorder %s1160_s19, 0  ;;  %p91_p3 = scmp.ne.s32.totalorder %s1144_s15, %s1140_s14 }
   0xe   : > { %s1792_s21 = smov (%p44_p0, %s42_s21), 0  ;;  %p92_p5 = scmp.eq.s32.totalorder %s846_s0, 0 }
   0xf   : > { %p1229_p4 = por %p86_p2, %p85_p1  ;;  %s73_s24 = ssub.s32 %s1156_s18, %s1792_s21 }
  0x10   : > { %p151_p6 = scmp.eq.s32.totalorder %s846_s0, 1  ;;  %p76_p7 = scmp.eq.s32.totalorder %s73_s24, 0 }
  0x11   : > { %p1235_p8 = por %p92_p5, %p91_p3  ;;  %p157_p10 = scmp.eq.s32.totalorder %s847_s20, 1 }
  0x12   : > { %p1239_p9 = por %p151_p6, %p85_p1  ;;  %p849_p12 = scmp.ge.s32.totalorder %s1160_s19, 2 }
  0x13   : > { %s1244_s27 = scalar_select %p76_p7, %s1148_s16, %s78_s22  }
  0x14   : > { %p1246_p11 = por %p157_p10, %p91_p3  ;;  %p893_p13 = scmp.lt.s32.totalorder %s1160_s19, 2 }
  0x15   : > { %s1253_s29 = sand.u32 1, %s1148_s16   ;;  %s874_s4 = sshll.u32 %s1156_s18, 3 }
  0x16   : > { %s850_s30 = sshll.u32 %s1253_s29, 3  ;;  %s193_s7 = scalar_lea.hbm %s1755_s1, %s874_s4 }
  0x17   : > { %s184_s8 = scalar_lea.vmem [#allocation3], %s850_s30  ;;  %s194_s10 = sshll.u32 %s193_s7, 4  ;;  %s195_s10 = int_to_ptr.hbm [resolvable:$true] %s194_s10 }
  0x18   : > { %s196_s9 = sshll.u32 %s184_s8, 4  ;;  %p1262_p0 = pnand %p893_p13, %p1229_p4  ;;  %s197_s9 = int_to_ptr.vmem [resolvable:$true] %s196_s9 }
  0x19   : > { %p856_p1 = scmp.ge.s32.totalorder %s1160_s19, 1  ;;  %s181_s12 = scalar_lea.sflag [#allocation4], %s1253_s29 }
  0x1a   : > { %s1162_s13 = smov 32   ;;  %s1163_s0 = smov 2  }
  0x1b   : > { %885 = dma.hbm_to_vmem [thread:$0]  (!%p1262_p0), %s195_s10, 128, %s197_s9, %s181_s12, %s1162_s13, %s1162_s13, %s1163_s0  }
  0x1c   : > { %p230_p2 = scmp.lt.s32.totalorder %s1160_s19, 3  ;;  %s219_s24 = scalar_lea.hbm %s1756_s2, %s874_s4 }
  0x1d   : > { %s220_s5 = sshll.u32 %s219_s24, 4  ;;  %s210_s23 = scalar_lea.vmem [#allocation6], %s850_s30  ;;  %s221_s5 = int_to_ptr.hbm [resolvable:$true] %s220_s5 }
  0x1e   : > { %p231_p3 = pnand %p856_p1, %p230_p2  ;;  %s222_s6 = sshll.u32 %s210_s23, 4  ;;  %s223_s6 = int_to_ptr.vmem [resolvable:$true] %s222_s6 }
  0x1f   : > { %s207_s7 = scalar_lea.sflag [#allocation7], %s1253_s29 }
  0x20   : > { %888 = dma.hbm_to_vmem [thread:$0]  (!%p1262_p0), %s221_s5, 128, %s223_s6, %s207_s7, %s1162_s13, %s1162_s13, %s1163_s0  }
  0x21   : > { %234 = sbr.rel (%p231_p3) target bundleno = 165 (0xa5), region = 32 }
  0x26   : > { %s1278_s8 = sand.u32 1, %s1144_s15  }
  0x27   : > { %s857_s9 = sshll.u32 %s1278_s8, 3  ;;  %s237_s10 = scalar_lea.sflag [#allocation4], %s1278_s8 }
  0x28   : > { %s240_s12 = scalar_lea.vmem [#allocation3], %s857_s9 }
  0x29   : > { %1127 = dma.done.wait (%p1235_p8), %s237_s10, 128  }
  0x2a   : > { %1129 = vsyncadd (%p1235_p8), %s237_s10, 4294967168  ;;  %s247_s29 = scalar_lea.sflag [#allocation7], %s1278_s8  ;;  %s1287_s30 = scalar_lea.vmem [#allocation6], %s857_s9 }
  0x2b   : > { %1131 = dma.done.wait (%p1235_p8), %s247_s29, 128  }
  0x2c   : > { %1133 = vsyncadd (%p1235_p8), %s247_s29, 4294967168  ;;  %s859_s4 = sshll.u32 %s1278_s8, 1  ;;  %v1164_v0 = vmov 0.0   ;;  %v290_v1 = vld [vmem:[%s240_s12] sm:$0x3]  ;;  %vm303_vm0 = vcmask 1041408  }
  0x2d   : > { %s1294_s11 = scalar_lea.vmem [#allocation8], %s859_s4  ;;  %v291_v2 = vld [vmem:[%s240_s12 + $0x2] sm:$0x3]  ;;  %v299_v3 = vadd.f32 1.0, %v290_v1  ;;  %v292_v5 = vld [vmem:[%s240_s12 + $0x4] sm:$0x3] }
  0x2e   : > { %289 = vst [vmem:[%s1294_s11] sm:$0x3] %v1164_v0  ;;  %v300_v4 = vadd.f32 1.0, %v291_v2  ;;  %v301_v8 = vadd.f32 1.0, %v292_v5  ;;  %v293_v9 = vld [vmem:[%s240_s12 + $0x6] sm:$0x3]  ;;  %s298_s25 = sld [smem:[#allocation2]] }
  0x2f   : > { %v304_v6 = vsel %vm303_vm0, %v299_v3, 0.0  ;;  %v302_v12 = vadd.f32 1.0, %v293_v9  ;;  %v1301_v16 = vadd.f32 2.0, %v299_v3  ;;  %v334_v19 = vadd.f32 1.0, %v299_v3  ;;  %v1312_v22 = vld [vmem:[%s1287_s30] sm:$0x3] }
  0x30   : > { %v305_v7 = vsel %vm303_vm0, %v300_v4, 0.0  ;;  %v307_v11 = vsel %vm303_vm0, %v301_v8, 0.0  ;;  %v1303_v17 = vadd.f32 2.0, %v300_v4  ;;  %v1305_v18 = vadd.f32 2.0, %v301_v8  ;;  %v1316_v24 = vld [vmem:[%s1287_s30 + $0x2] sm:$0x3] }
  0x31   : > { %v306_v10 = vadd.f32 %v305_v7, %v304_v6  ;;  %v309_v14 = vsel %vm303_vm0, %v302_v12, 0.0  ;;  %v335_v20 = vadd.f32 1.0, %v300_v4  ;;  %v1309_v21 = vadd.f32 2.0, %v302_v12  ;;  %v1319_v29 = vld [vmem:[%s1287_s30 + $0x4] sm:$0x3]  ;;  %s871_s13 = sshll.u32 %s1152_s17, 1 }
  0x32   : > { %v338_v25 = vmul.f32 %v334_v19, %v299_v3  ;;  %1769 = vst [vmem:[#allocation12_spill] sm:$0xff] %v1319_v29  ;;  %v449_v30 = vsub.f32 1.0, %v1312_v22  ;;  %v1324_v31 = vld [vmem:[%s1287_s30 + $0x6] sm:$0x3]  ;;  %v336_v33 = vadd.f32 1.0, %v301_v8  ;;  %v450_v34 = vsub.f32 1.0, %v1316_v24  ;;  %s732_s22 = scalar_lea.hbm %s1757_s3, %s871_s13 }
  0x33   : > { %v308_v13 = vadd.f32 %v307_v11, %v306_v10  ;;  %v339_v27 = vmul.f32 %v335_v20, %v300_v4  ;;  %1770 = vst [vmem:[#allocation13_spill] sm:$0xff] %v1324_v31  ;;  %v326_v35 = vmul.f32 2.0, %v299_v3  ;;  %v337_v36 = vadd.f32 1.0, %v302_v12  ;;  %s734_s24 = sshll.u32 %s1294_s11, 4  ;;  %s736_s5 = sshll.u32 %s732_s22, 4  ;;  %s735_s24 = int_to_ptr.vmem [resolvable:$true] %s734_s24  ;;  %s737_s5 = int_to_ptr.hbm [resolvable:$true] %s736_s5 }
  0x34   : > { %v327_v39 = vmul.f32 2.0, %v300_v4  ;;  %v451_v41 = vsub.f32 1.0, %v1319_v29  ;;  %v328_v42 = vmul.f32 2.0, %v301_v8  ;;  %v452_v43 = vsub.f32 1.0, %v1324_v31  ;;  %s721_s23 = scalar_lea.sflag [#allocation5], %s1278_s8  ;;  %s1088_s17 = sshra.s32 %s737_s5, 4  ;;  %s1089_s17 = int_to_ptr.hbm [resolvable:$true] %s1088_s17 }
  0x35   : > { %v310_v15 = vadd.f32 %v309_v14, %v308_v13  ;;  %v453_v44 = vmul.f32 %v449_v30, %v299_v3  ;;  %v340_v46 = vmul.f32 %v336_v33, %v301_v8  ;;  %v454_v47 = vmul.f32 %v450_v34, %v300_v4  ;;  %s1090_s6 = scalar_lea.hbm %s1089_s17, 2  ;;  %s1094_s10 = scalar_lea.hbm %s1757_s3, 4 }
  0x36   : > { %v329_v49 = vmul.f32 2.0, %v302_v12  ;;  %v341_v50 = vmul.f32 %v337_v36, %v302_v12  ;;  %v1332_v53 = vadd.f32 1.0, %v326_v35  ;;  %v1334_v54 = vadd.f32 1.0, %v327_v39  ;;  %p1091_p4 = scmp.ne.s32.totalorder %s1089_s17, %s1090_s6  ;;  %p1095_p7 = scmp.lt.s32.totalorder %s1089_s17, %s1757_s3 }
  0x37   : > { %946 = vrcp.f32 %v310_v15  ;;  %v455_v56 = vmul.f32 %v451_v41, %v301_v8  ;;  %v1336_v58 = vadd.f32 1.0, %v328_v42  ;;  %v456_v59 = vmul.f32 %v452_v43, %v302_v12  ;;  %p1096_p8 = scmp.lt.s32.totalorder %s1094_s10, %s1090_s6 }
  0x38   : > { %948 = vrcp.f32 %v1301_v16  ;;  %v1339_v60 = vadd.f32 %v453_v44, %v1312_v22  ;;  %v1345_v0 = vadd.f32 %v454_v47, %v1316_v24  ;;  %v1347_v1 = vadd.f32 1.0, %v329_v49  ;;  %p1092_p5 = pnand %p1091_p4, %p1239_p9 }
  0x39   : > { %950 = vrcp.f32 %v1303_v17  ;;  %v1355_v6 = vadd.f32 %v455_v56, %v1319_v29  ;;  %v1358_v8 = vadd.f32 %v456_v59, %v1324_v31  ;;  %p1097_p10 = por %p1096_p8, %p1095_p7 }
  0x3a   : > { %952 = vrcp.f32 %v1305_v18  ;;  %1771 = vst [vmem:[#allocation14_spill] sm:$0xff] %v1339_v60  ;;  %v461_v9 = vsel %vm303_vm0, %v1339_v60, 0.0  ;;  %v468_v10 = vadd.f32 6.0, %v1339_v60  ;;  %v462_v13 = vsel %vm303_vm0, %v1345_v0, 0.0  ;;  %p1093_p6 = pneg %p1092_p5 }
  0x3b   : > { %954 = vrcp.f32 %v1309_v21  ;;  %1772 = vst [vmem:[#allocation15_spill] sm:$0xff] %v1345_v0  ;;  %v469_v14 = vadd.f32 6.0, %v1345_v0  ;;  %v470_v20 = vadd.f32 6.0, %v1355_v6  ;;  %v463_v30 = vadd.f32 %v462_v13, %v461_v9 }
  0x3c   : > { %956 = vrcp.f32 %v338_v25  ;;  %1773 = vst [vmem:[#allocation16_spill] sm:$0xff] %v1355_v6  ;;  %v472_v33 = vmul.f32 %v468_v10, %v1339_v60  ;;  %v1409_v47 = vsel %vm303_vm0, %v1358_v8, 0.0  ;;  %p1098_p13 = pnand %p1097_p10, %p1093_p6 }
  0x3d   : > { %v947_v23 = vpop.eup %946  ;;  %958 = vrcp.f32 %v339_v27  ;;  %1774 = vst [vmem:[#allocation17_spill] sm:$0xff] %v1358_v8  ;;  %v473_v36 = vmul.f32 %v469_v14, %v1345_v0 }
  0x3e   : > { %v949_v26 = vpop.eup %948  ;;  %v314_v32 = vmul.f32 %v947_v23, %v310_v15  ;;  %960 = vlog2.f32 %v310_v15 }
  0x3f   : > { %v951_v28 = vpop.eup %950  ;;  %v382_v37 = vmul.f32 %v949_v26, %v1301_v16  ;;  %962 = vrcp.f32 %v340_v46  ;;  %v477_v56 = vadd.f32 11.0, %v473_v36 }
  0x40   : > { %v953_v38 = vpop.eup %952  ;;  %v383_v40 = vmul.f32 %v951_v28, %v1303_v17  ;;  %v315_v45 = vsub.f32 2.0, %v314_v32  ;;  %964 = vrcp.f32 %v341_v50  ;;  %v464_v32 = vsel %vm303_vm0, %v1355_v6, 0.0 }
  0x41   : > { %v955_v48 = vpop.eup %954  ;;  %v384_v51 = vmul.f32 %v953_v38, %v1305_v18  ;;  %v386_v52 = vsub.f32 2.0, %v382_v37  ;;  %966 = vlog2.f32 %v1301_v16 }
  0x42   : > { %v387_v55 = vsub.f32 2.0, %v383_v40  ;;  %v957_v57 = vpop.eup %956  ;;  %v1341_v62 = vmul.f32 %v947_v23, %v315_v45  ;;  %v385_v63 = vmul.f32 %v955_v48, %v1309_v21  ;;  %968 = vlog2.f32 %v1303_v17 }
  0x43   : > { %v959_v61 = vpop.eup %958  ;;  %v388_v2 = vsub.f32 2.0, %v384_v51  ;;  %v1349_v3 = vmul.f32 %v949_v26, %v386_v52  ;;  %v350_v4 = vmul.f32 %v957_v57, %v338_v25  ;;  %970 = vlog2.f32 %v1305_v18 }
  0x44   : > { %v1352_v5 = vmul.f32 %v951_v28, %v387_v55  ;;  %v351_v7 = vmul.f32 %v959_v61, %v339_v27  ;;  %v1365_v11 = vmul.f32 %v1341_v62, %v1341_v62  ;;  %v389_v12 = vsub.f32 2.0, %v385_v63  ;;  %v961_v15 = vpop.eup %960 }
  0x45   : > { %v1371_v16 = vmul.f32 %v953_v38, %v388_v2  ;;  %v1375_v19 = vmul.f32 %v1349_v3, %v1349_v3  ;;  %v963_v23 = vpop.eup %962  ;;  %v354_v25 = vsub.f32 2.0, %v350_v4  ;;  %v471_v27 = vadd.f32 6.0, %v1358_v8 }
  0x46   : > { %v1381_v26 = vmul.f32 %v1352_v5, %v1352_v5  ;;  %v1384_v28 = vpop.eup %964  ;;  %v355_v17 = vsub.f32 2.0, %v351_v7  ;;  %v320_v35 = vmul.f32 0.003968254, %v1365_v11  ;;  %972 = vlog2.f32 %v1309_v21 }
  0x47   : > { %v967_v34 = vpop.eup %966  ;;  %v1391_v18 = vmul.f32 %v955_v48, %v389_v12  ;;  %v352_v37 = vmul.f32 %v963_v23, %v340_v46  ;;  %v1396_v38 = vmul.f32 %v1371_v16, %v1371_v16  ;;  %v406_v39 = vmul.f32 0.003968254, %v1375_v19 }
  0x48   : > { %v474_v40 = vmul.f32 %v470_v20, %v1355_v6  ;;  %v1400_v41 = vmul.f32 0.6931472, %v961_v15  ;;  %v358_v42 = vmul.f32 %v957_v57, %v354_v25  ;;  %v407_v43 = vmul.f32 0.003968254, %v1381_v26  ;;  %v969_v44 = vpop.eup %968 }
  0x49   : > { %v475_v21 = vmul.f32 %v471_v27, %v1358_v8  ;;  %v1405_v45 = vmul.f32 %v1384_v28, %v341_v50  ;;  %v359_v46 = vmul.f32 %v959_v61, %v355_v17  ;;  %v476_v48 = vadd.f32 11.0, %v472_v33  ;;  %v971_v49 = vpop.eup %970 }
  0x4a   : > { %v321_v51 = vsub.f32 0.008333334, %v320_v35  ;;  %v1413_v52 = vmul.f32 %v1391_v18, %v1391_v18  ;;  %v1415_v55 = vadd.f32 %v464_v32, %v463_v30  ;;  %v356_v57 = vsub.f32 2.0, %v352_v37 }
  0x4b   : > { %v408_v59 = vmul.f32 0.003968254, %v1396_v38  ;;  %v410_v50 = vsub.f32 0.008333334, %v406_v39  ;;  %v478_v63 = vadd.f32 11.0, %v474_v40  ;;  %v1419_v2 = vmul.f32 %v358_v42, %v1332_v53 }
  0x4c   : > { %v973_v61 = vpop.eup %972  ;;  %v371_v4 = vmul.f32 0.6931472, %v967_v34  ;;  %v411_v7 = vsub.f32 0.008333334, %v407_v43  ;;  %v479_v9 = vadd.f32 11.0, %v475_v21  ;;  %v1422_v10 = vmul.f32 0.5, %v1341_v62 }
  0x4d   : > { %v357_v12 = vsub.f32 2.0, %v1405_v45  ;;  %v1426_v13 = vmul.f32 %v359_v46, %v1334_v54  ;;  %v480_v14 = vmul.f32 %v476_v48, %v1339_v60  ;;  %v322_v15 = vmul.f32 %v321_v51, %v1365_v11 }
  0x4e   : > { %v373_v20 = vmul.f32 0.6931472, %v969_v44  ;;  %v409_v25 = vmul.f32 0.003968254, %v1413_v52  ;;  %v481_v53 = vmul.f32 %v477_v56, %v1345_v0  ;;  %v360_v27 = vmul.f32 %v963_v23, %v356_v57 }
  0x4f   : > { %v412_v17 = vsub.f32 0.008333334, %v408_v59  ;;  %v414_v30 = vmul.f32 %v410_v50, %v1375_v19  ;;  %v482_v62 = vmul.f32 %v478_v63, %v1355_v6  ;;  %v1434_v32 = vmul.f32 0.6931472, %v971_v49 }
  0x50   : > { %v1436_v33 = vmul.f32 0.6931472, %v973_v61  ;;  %v415_v54 = vmul.f32 %v411_v7, %v1381_v26  ;;  %v483_v34 = vmul.f32 %v479_v9, %v1358_v8  ;;  %v319_v35 = vsub.f32 %v1400_v41, %v1422_v10 }
  0x51   : > { %v398_v36 = vmul.f32 0.5, %v1349_v3  ;;  %v484_v37 = vadd.f32 6.0, %v480_v14  ;;  %v496_v23 = vmul.f32 4.0, %v1339_v60  ;;  %v323_v39 = vsub.f32 0.083333336, %v322_v15 }
  0x52   : > { %v413_v40 = vsub.f32 0.008333334, %v409_v25  ;;  %v485_v42 = vadd.f32 6.0, %v481_v53  ;;  %v497_v43 = vmul.f32 4.0, %v1345_v0  ;;  %v399_v21 = vmul.f32 0.5, %v1352_v5 }
  0x53   : > { %v416_v44 = vmul.f32 %v412_v17, %v1396_v38  ;;  %v418_v46 = vsub.f32 0.083333336, %v414_v30  ;;  %v486_v48 = vadd.f32 6.0, %v482_v62  ;;  %v400_v49 = vmul.f32 0.5, %v1371_v16 }
  0x54   : > { %v419_v51 = vsub.f32 0.083333336, %v415_v54  ;;  %v487_v41 = vadd.f32 6.0, %v483_v34  ;;  %v498_v3 = vmul.f32 4.0, %v1355_v6  ;;  %v402_v56 = vsub.f32 %v371_v4, %v398_v36 }
  0x55   : > { %v1450_v57 = vmul.f32 %v484_v37, %v1339_v60  ;;  %v499_v59 = vmul.f32 4.0, %v1358_v8  ;;  %v500_v50 = vadd.f32 18.0, %v496_v23  ;;  %v324_v63 = vmul.f32 %v323_v39, %v1365_v11 }
  0x56   : > { %v417_v5 = vmul.f32 %v413_v40, %v1413_v52  ;;  %v1456_v61 = vmul.f32 %v485_v42, %v1345_v0  ;;  %v501_v7 = vadd.f32 18.0, %v497_v43  ;;  %v401_v16 = vmul.f32 0.5, %v1391_v18 }
  0x57   : > { %v420_v9 = vsub.f32 0.083333336, %v416_v44  ;;  %v422_v10 = vmul.f32 %v418_v46, %v1375_v19  ;;  %v1461_v4 = vmul.f32 %v486_v48, %v1355_v6  ;;  %v403_v14 = vsub.f32 %v373_v20, %v399_v21 }
  0x58   : > { %v423_v15 = vmul.f32 %v419_v51, %v1381_v26  ;;  %v1465_v25 = vmul.f32 %v487_v41, %v1358_v8  ;;  %v502_v11 = vadd.f32 18.0, %v498_v3  ;;  %v404_v53 = vsub.f32 %v1434_v32, %v400_v49 }
  0x59   : > { %v503_v17 = vadd.f32 18.0, %v499_v59  ;;  %v504_v30 = vmul.f32 %v500_v50, %v1339_v60  ;;  %974 = vrcp.f32 %v1450_v57  ;;  %v421_v18 = vsub.f32 0.083333336, %v417_v5 }
  0x5a   : > { %v505_v19 = vmul.f32 %v501_v7, %v1345_v0  ;;  %976 = vrcp.f32 %v1456_v61  ;;  %v1473_v20 = vadd.f32 4.0, %v1339_v60  ;;  %v424_v26 = vmul.f32 %v420_v9, %v1396_v38 }
  0x5b   : > { %v426_v62 = vsub.f32 %v402_v56, %v422_v10  ;;  %978 = vrcp.f32 %v1461_v4  ;;  %v1478_v32 = vadd.f32 4.0, %v1345_v0  ;;  %v427_v54 = vsub.f32 %v403_v14, %v423_v15 }
  0x5c   : > { %v506_v34 = vmul.f32 %v502_v11, %v1355_v6  ;;  %980 = vrcp.f32 %v1465_v25  ;;  %v1483_v36 = vadd.f32 4.0, %v1355_v6  ;;  %v507_v37 = vmul.f32 %v503_v17, %v1358_v8 }
  0x5d   : > { %v508_v23 = vadd.f32 22.0, %v504_v30  ;;  %v1487_v39 = vadd.f32 4.0, %v1358_v8  ;;  %982 = vlog2.f32 %v1473_v20  ;;  %v361_v38 = vmul.f32 %v1384_v28, %v357_v12 }
  0x5e   : > { %v1494_v40 = vmul.f32 %v360_v27, %v1336_v58  ;;  %v509_v42 = vadd.f32 22.0, %v505_v19  ;;  %984 = vrcp.f32 %v1473_v20  ;;  %v1499_v21 = vsub.f32 %v319_v35, %v324_v63 }
  0x5f   : > { %v1497_v43 = vpop.eup %974  ;;  %v405_v44 = vsub.f32 %v1436_v33, %v401_v16  ;;  %v425_v46 = vmul.f32 %v421_v18, %v1413_v52  ;;  %986 = vrcp.f32 %v1478_v32  ;;  %v1506_v45 = vsub.f32 %v404_v53, %v424_v26 }
  0x60   : > { %v1504_v48 = vpop.eup %976  ;;  %v430_v58 = vsub.f32 %v426_v62, %v1419_v2  ;;  %v431_v28 = vsub.f32 %v427_v54, %v1426_v13  ;;  %988 = vrcp.f32 %v1483_v36  ;;  %v510_v27 = vadd.f32 22.0, %v506_v34 }
  0x61   : > { %v1511_v12 = vpop.eup %978  ;;  %v511_v35 = vadd.f32 22.0, %v507_v37  ;;  %v512_v33 = vmul.f32 %v508_v23, %v1339_v60  ;;  %990 = vrcp.f32 %v1487_v39  ;;  %v513_v49 = vmul.f32 %v509_v42, %v1345_v0 }
  0x62   : > { %v1515_v52 = vpop.eup %980  ;;  %992 = vlog2.f32 %v1478_v32  ;;  %v1520_v2 = vmul.f32 %v361_v38, %v1347_v1  ;;  %v1522_v13 = vsub.f32 %v405_v44, %v425_v46  ;;  %v1526_v41 = vadd.f32 %v1409_v47, %v1415_v55 }
  0x63   : > { %v983_v51 = vpop.eup %982  ;;  %994 = vlog2.f32 %v1483_v36  ;;  %v1532_v59 = vsub.f32 %v1499_v21, %v430_v58  ;;  %v1535_v50 = vsub.f32 %v1499_v21, %v431_v28  ;;  %v514_v63 = vmul.f32 %v510_v27, %v1355_v6 }
  0x64   : > { %v985_v3 = vpop.eup %984  ;;  %996 = vlog2.f32 %v1487_v39  ;;  %v515_v47 = vmul.f32 %v511_v35, %v1358_v8  ;;  %v516_v55 = vadd.f32 6.0, %v512_v33  ;;  %v1541_v16 = vadd.f32 6.0, %v513_v49 }
  0x65   : > { %v987_v1 = vpop.eup %986  ;;  %v564_v5 = vmul.f32 %v985_v3, %v1473_v20  ;;  %v524_v9 = vmul.f32 %v1497_v43, %v1450_v57  ;;  %998 = vlog2.f32 %v1450_v57  ;;  %v860_v53 = vadd.f32 -0.5, %v1473_v20 }
  0x66   : > { %v989_v7 = vpop.eup %988  ;;  %v565_v10 = vmul.f32 %v987_v1, %v1478_v32  ;;  %v861_v17 = vadd.f32 -0.5, %v1478_v32  ;;  %v525_v18 = vmul.f32 %v1504_v48, %v1456_v61  ;;  %v1554_v62 = vadd.f32 1.0, %v1526_v41 }
  0x67   : > { %v991_v14 = vpop.eup %990  ;;  %v566_v15 = vmul.f32 %v989_v7, %v1483_v36  ;;  %v568_v11 = vsub.f32 2.0, %v564_v5  ;;  %1000 = vlog2.f32 %v1456_v61  ;;  %v862_v37 = vadd.f32 -0.5, %v1483_v36 }
  0x68   : > { %v993_v30 = vpop.eup %992  ;;  %v567_v19 = vmul.f32 %v991_v14, %v1487_v39  ;;  %v569_v26 = vsub.f32 2.0, %v565_v10  ;;  %v528_v38 = vsub.f32 2.0, %v524_v9  ;;  %v863_v46 = vadd.f32 -0.5, %v1487_v39 }
  0x69   : > { %v995_v57 = vpop.eup %994  ;;  %v570_v54 = vsub.f32 2.0, %v566_v15  ;;  %v1557_v34 = vmul.f32 %v985_v3, %v568_v11  ;;  %v526_v58 = vmul.f32 %v1511_v12, %v1461_v4  ;;  %v527_v28 = vmul.f32 %v1515_v52, %v1465_v25 }
  0x6a   : > { %v997_v23 = vpop.eup %996  ;;  %v571_v42 = vsub.f32 2.0, %v567_v19  ;;  %v1560_v44 = vmul.f32 %v987_v1, %v569_v26  ;;  %1002 = vlog2.f32 %v1461_v4  ;;  %v529_v35 = vsub.f32 2.0, %v525_v18 }
  0x6b   : > { %v1568_v61 = vmul.f32 %v989_v7, %v570_v54  ;;  %v999_v27 = vpop.eup %998  ;;  %v1570_v33 = vmul.f32 0.6931472, %v983_v51  ;;  %v1572_v49 = vmul.f32 0.6931472, %v993_v30  ;;  %1004 = vlog2.f32 %v1465_v25 }
  0x6c   : > { %v1574_v3 = vmul.f32 %v991_v14, %v571_v42  ;;  %v1577_v1 = vmul.f32 0.6931472, %v995_v57  ;;  %v1579_v5 = vmul.f32 0.6931472, %v997_v23  ;;  %v1583_v9 = vmul.f32 %v1557_v34, %v1557_v34 }
  0x6d   : > { %v1585_v4 = vadd.f32 6.0, %v514_v63  ;;  %v532_v7 = vmul.f32 %v1497_v43, %v528_v38  ;;  %v1590_v51 = vmul.f32 %v1560_v44, %v1560_v44  ;;  %v1594_v10 = vmul.f32 %v1568_v61, %v1568_v61  ;;  %v1001_v25 = vpop.eup %1000 }
  0x6e   : > { %v1596_v14 = vadd.f32 6.0, %v515_v47  ;;  %v530_v15 = vsub.f32 2.0, %v526_v58  ;;  %v1598_v11 = vmul.f32 0.6931472, %v999_v27  ;;  %v1602_v63 = vmul.f32 %v1574_v3, %v1574_v3 }
  0x6f   : > { %v531_v30 = vsub.f32 2.0, %v527_v28  ;;  %v533_v43 = vmul.f32 %v1504_v48, %v529_v35  ;;  %v616_v18 = vmul.f32 %v860_v53, %v1570_v33  ;;  %v617_v19 = vmul.f32 %v861_v17, %v1572_v49 }
  0x70   : > { %v1003_v26 = vpop.eup %1002  ;;  %v588_v57 = vmul.f32 0.003968254, %v1583_v9  ;;  %v618_v47 = vmul.f32 %v862_v37, %v1577_v1  ;;  %v619_v54 = vmul.f32 %v863_v46, %v1579_v5  ;;  %1006 = vrcp.f32 %v1554_v62 }
  0x71   : > { %v1611_v23 = vmul.f32 %v532_v7, %v516_v55  ;;  %v1613_v38 = vmul.f32 0.6931472, %v1001_v25  ;;  %v589_v42 = vmul.f32 0.003968254, %v1590_v51  ;;  %v590_v48 = vmul.f32 0.003968254, %v1594_v10  ;;  %v1005_v53 = vpop.eup %1004 }
  0x72   : > { %v1618_v17 = vmul.f32 %v1511_v12, %v530_v15  ;;  %v591_v58 = vmul.f32 0.003968254, %v1602_v63  ;;  %v628_v37 = vmul.f32 0.0027777778, %v1583_v9  ;;  %1008 = vlog2.f32 %v1554_v62 }
  0x73   : > { %v1623_v46 = vmul.f32 0.6931472, %v1003_v26  ;;  %v620_v55 = vsub.f32 %v616_v18, %v1473_v20  ;;  %v621_v28 = vsub.f32 %v617_v19, %v1478_v32  ;;  %v629_v27 = vmul.f32 0.0027777778, %v1590_v51 }
  0x74   : > { %v592_v35 = vsub.f32 0.008333334, %v588_v57  ;;  %v622_v7 = vsub.f32 %v618_v47, %v1483_v36  ;;  %v623_v12 = vsub.f32 %v619_v54, %v1487_v39  ;;  %1010 = vrcp.f32 %v1526_v41 }
  0x75   : > { %v1632_v25 = vmul.f32 %v1515_v52, %v531_v30  ;;  %v1634_v15 = vmul.f32 0.6931472, %v1005_v53  ;;  %v593_v26 = vsub.f32 0.008333334, %v589_v42  ;;  %v594_v56 = vsub.f32 0.008333334, %v590_v48 }
  0x76   : > { %v1007_v31 = vpop.eup %1006  ;;  %v1637_v20 = vmul.f32 %v533_v43, %v1541_v16  ;;  %v595_v32 = vsub.f32 0.008333334, %v591_v58  ;;  %v630_v18 = vmul.f32 0.0027777778, %v1594_v10  ;;  %v632_v19 = vsub.f32 0.083333336, %v628_v37 }
  0x77   : > { %1775 = vst [vmem:[#allocation18_spill] sm:$0xff] %v1634_v15  ;;  %v624_v36 = vadd.f32 0.9189385, %v620_v55  ;;  %v625_v57 = vadd.f32 0.9189385, %v621_v28  ;;  %1012 = vlog2.f32 %v1526_v41  ;;  %v596_v52 = vmul.f32 %v592_v35, %v1583_v9 }
  0x78   : > { %1776 = vst [vmem:[#allocation19_spill] sm:$0xff] %v1637_v20  ;;  %v633_v39 = vsub.f32 0.083333336, %v629_v27  ;;  %v1009_v47 = vpop.eup %1008  ;;  %v626_v30 = vadd.f32 0.9189385, %v622_v7  ;;  %v580_v48 = vmul.f32 0.5, %v1557_v34  ;;  %v597_v16 = vmul.f32 %v593_v26, %v1590_v51 }
  0x79   : > { %v627_v54 = vadd.f32 0.9189385, %v623_v12  ;;  %v631_v42 = vmul.f32 0.0027777778, %v1602_v63  ;;  %v598_v43 = vmul.f32 %v594_v56, %v1594_v10  ;;  %v663_v53 = vmul.f32 %v1007_v31, %v1554_v62 }
  0x7a   : > { %v1647_v58 = vpop.eup %1010  ;;  %v599_v37 = vmul.f32 %v595_v32, %v1602_v63  ;;  %v634_v55 = vsub.f32 0.083333336, %v630_v18  ;;  %v636_v28 = vmul.f32 %v632_v19, %v1557_v34  ;;  %v864_v27 = vadd.f32 -0.5, %v1554_v62 }
  0x7b   : > { %v581_v35 = vmul.f32 0.5, %v1560_v44  ;;  %v637_v7 = vmul.f32 %v633_v39, %v1560_v44  ;;  %v1654_v12 = vmul.f32 0.6931472, %v1009_v47  ;;  %v664_v26 = vsub.f32 2.0, %v663_v53 }
  0x7c   : > { %v582_v56 = vmul.f32 0.5, %v1568_v61  ;;  %v583_v8 = vmul.f32 0.5, %v1574_v3  ;;  %v600_v6 = vsub.f32 0.083333336, %v596_v52  ;;  %v635_v0 = vsub.f32 0.083333336, %v631_v42 }
  0x7d   : > { %v1013_v60 = vpop.eup %1012  ;;  %v601_v32 = vsub.f32 0.083333336, %v597_v16  ;;  %v602_v18 = vsub.f32 0.083333336, %v598_v43  ;;  %v654_v34 = vmul.f32 %v1647_v58, %v1526_v41  ;;  %v665_v19 = vmul.f32 %v1007_v31, %v664_v26 }
  0x7e   : > { %v603_v29 = vsub.f32 0.083333336, %v599_v37  ;;  %v638_v15 = vmul.f32 %v634_v55, %v1568_v61  ;;  %v640_v44 = vadd.f32 %v636_v28, %v624_v36  ;;  %v676_v39 = vmul.f32 %v864_v27, %v1654_v12 }
  0x7f   : > { %v584_v47 = vsub.f32 %v1570_v33, %v580_v48  ;;  %v585_v53 = vsub.f32 %v1572_v49, %v581_v35  ;;  %v641_v20 = vadd.f32 %v637_v7, %v625_v57  ;;  %v666_v52 = vmul.f32 %v665_v19, %v665_v19  ;;  %v1778_v26 = vld [vmem:[#allocation19_spill] sm:$0xff] }
  0x80   : > { %v586_v42 = vsub.f32 %v1577_v1, %v582_v56  ;;  %v587_v16 = vsub.f32 %v1579_v5, %v583_v8  ;;  %v604_v43 = vmul.f32 %v600_v6, %v1583_v9  ;;  %v639_v31 = vmul.f32 %v635_v0, %v1574_v3 }
  0x81   : > { %v605_v41 = vmul.f32 %v601_v32, %v1590_v51  ;;  %v606_v61 = vmul.f32 %v602_v18, %v1594_v10  ;;  %v669_v36 = vmul.f32 0.003968254, %v666_v52  ;;  %v679_v37 = vmul.f32 0.0027777778, %v666_v52 }
  0x82   : > { %v607_v33 = vmul.f32 %v603_v29, %v1602_v63  ;;  %v642_v48 = vadd.f32 %v638_v15, %v626_v30  ;;  %v648_v49 = vsub.f32 %v640_v44, %v1598_v11  ;;  %v677_v57 = vsub.f32 %v676_v39, %v1554_v62  ;;  %v1782_v44 = vld [vmem:[#allocation15_spill] sm:$0xff] }
  0x83   : > { %v649_v1 = vsub.f32 %v641_v20, %v1613_v38  ;;  %v667_v8 = vmul.f32 0.5, %v665_v19  ;;  %v670_v5 = vsub.f32 0.008333334, %v669_v36  ;;  %v680_v6 = vsub.f32 0.083333336, %v679_v37 }
  0x84   : > { %v538_v0 = vmul.f32 %v1618_v17, %v1585_v4  ;;  %v539_v3 = vmul.f32 %v1632_v25, %v1596_v14  ;;  %v608_v9 = vsub.f32 %v584_v47, %v604_v43  ;;  %v655_v51 = vsub.f32 2.0, %v654_v34  ;;  %v1783_v47 = vld [vmem:[#allocation16_spill] sm:$0xff] }
  0x85   : > { %v609_v10 = vsub.f32 %v585_v53, %v605_v41  ;;  %v610_v29 = vsub.f32 %v586_v42, %v606_v61  ;;  %v643_v63 = vadd.f32 %v639_v31, %v627_v54  ;;  %v671_v15 = vmul.f32 %v670_v5, %v666_v52 }
  0x86   : > { %v611_v11 = vsub.f32 %v587_v16, %v607_v33  ;;  %v650_v62 = vsub.f32 %v642_v48, %v1623_v46  ;;  %v678_v30 = vadd.f32 0.9189385, %v677_v57  ;;  %v681_v38 = vmul.f32 %v680_v6, %v665_v19 }
  0x87   : > { %v668_v20 = vsub.f32 %v1654_v12, %v667_v8  ;;  %v672_v55 = vsub.f32 0.083333336, %v671_v15  ;;  %v686_v28 = vsel %vm303_vm0, %v648_v49, 0.0  ;;  %v687_v4 = vsel %vm303_vm0, %v649_v1, 0.0  ;;  %v1785_v1 = vld [vmem:[#allocation13_spill] sm:$0xff] }
  0x88   : > { %v433_v14 = vsub.f32 %v1522_v13, %v1520_v2  ;;  %v1777_v17 = vsub.f32 %v1506_v45, %v1494_v40  ;;  %v438_v46 = vmul.f32 %v1532_v59, %v1312_v22  ;;  %v439_v54 = vmul.f32 %v1535_v50, %v1316_v24  ;;  %v1779_v2 = vld [vmem:[#allocation18_spill] sm:$0xff]  ;;  %v1780_v24 = vld [vmem:[#allocation12_spill] sm:$0xff] }
  0x89   : > { %v644_v27 = vsub.f32 %v608_v9, %v1611_v23  ;;  %v656_v35 = vmul.f32 %v1647_v58, %v655_v51  ;;  %v658_v7 = vmul.f32 0.6931472, %v1013_v60  ;;  %v673_v12 = vmul.f32 %v672_v55, %v666_v52  ;;  %v1781_v58 = vld [vmem:[#allocation14_spill] sm:$0xff]  ;;  %v1784_v52 = vld [vmem:[#allocation17_spill] sm:$0xff] }
  0x8a   : > { %v436_v25 = vsub.f32 %v1499_v21, %v1777_v17  ;;  %v645_v56 = vsub.f32 %v609_v10, %v1778_v26  ;;  %v651_v13 = vsub.f32 %v643_v63, %v1779_v2  ;;  %v682_v32 = vadd.f32 %v681_v38, %v678_v30 }
  0x8b   : > { %v688_v40 = vadd.f32 %v687_v4, %v686_v28  ;;  %v646_v45 = vsub.f32 %v610_v29, %v538_v0  ;;  %v647_v18 = vsub.f32 %v611_v11, %v539_v3  ;;  %v674_v34 = vsub.f32 %v668_v20, %v673_v12 }
  0x8c   : > { %v689_v22 = vsel %vm303_vm0, %v650_v62, 0.0  ;;  %v437_v59 = vsub.f32 %v1499_v21, %v433_v14  ;;  %v440_v50 = vmul.f32 %v436_v25, %v1780_v24  ;;  %v442_v23 = vsel %vm303_vm0, %v438_v46, 0.0  ;;  %v717_v14 = vld [vmem:[%s1294_s11] sm:$0x3] }
  0x8d   : > { %v866_v60 = vadd.f32 -1.0, %v1781_v58  ;;  %v683_v19 = vsub.f32 %v674_v34, %v656_v35  ;;  %v867_v39 = vadd.f32 -1.0, %v1782_v44  ;;  %v868_v53 = vadd.f32 -1.0, %v1783_v47 }
  0x8e   : > { %v869_v42 = vadd.f32 -1.0, %v1784_v52  ;;  %v443_v16 = vsel %vm303_vm0, %v439_v54, 0.0  ;;  %v684_v43 = vsub.f32 %v682_v32, %v658_v7  ;;  %v690_v31 = vadd.f32 %v689_v22, %v688_v40 }
  0x8f   : > { %v691_v41 = vsel %vm303_vm0, %v651_v13, 0.0  ;;  %v698_v21 = vsub.f32 %v644_v27, %v683_v19  ;;  %v699_v61 = vsub.f32 %v645_v56, %v683_v19  ;;  %v700_v36 = vsub.f32 %v646_v45, %v683_v19 }
  0x90   : > { %v701_v37 = vsub.f32 %v647_v18, %v683_v19  ;;  %v441_v8 = vmul.f32 %v437_v59, %v1785_v1  ;;  %v444_v5 = vadd.f32 %v443_v16, %v442_v23  ;;  %v865_v6 = vadd.f32 -1.7917595, %v684_v43 }
  0x91   : > { %v702_v33 = vmul.f32 %v866_v60, %v698_v21  ;;  %v703_v48 = vmul.f32 %v867_v39, %v699_v61  ;;  %v704_v49 = vmul.f32 %v868_v53, %v700_v36  ;;  %v692_v0 = vadd.f32 %v691_v41, %v690_v31 }
  0x92   : > { %v705_v57 = vmul.f32 %v869_v42, %v701_v37  ;;  %v445_v3 = vsel %vm303_vm0, %v440_v50, 0.0  ;;  %v447_v30 = vsel %vm303_vm0, %v441_v8, 0.0  ;;  %v714_v20 = vstv %s298_s25 }
  0x93   : > { %v706_v9 = vsel %vm303_vm0, %v702_v33, 0.0  ;;  %v707_v51 = vsel %vm303_vm0, %v703_v48, 0.0  ;;  %v709_v10 = vsel %vm303_vm0, %v704_v49, 0.0  ;;  %v446_v15 = vadd.f32 %v445_v3, %v444_v5 }
  0x94   : > { %v708_v29 = vadd.f32 %v707_v51, %v706_v9  ;;  %v711_v63 = vsel %vm303_vm0, %v705_v57, 0.0  ;;  %v693_v11 = vsub.f32 %v865_v6, %v692_v0 }
  0x95   : > { %v448_v55 = vadd.f32 %v447_v30, %v446_v15 }
  0x96   : > { %v710_v62 = vadd.f32 %v709_v10, %v708_v29 }
  0x98   : > { %v712_v38 = vadd.f32 %v711_v63, %v710_v62 }
  0x9a   : > { %v713_v28 = vadd.f32 %v712_v38, %v693_v11 }
  0x9c   : > { %v715_v4 = vmul.f32 %v714_v20, %v713_v28 }
  0x9e   : > { %v716_v17 = vadd.f32 %v715_v4, %v448_v55 }
  0xa0   : > { %v718_v25 = vadd.f32 %v717_v14, %v716_v17 }
  0xa2   : > { %719 = vst [vmem:[%s1294_s11] sm:$0x3] %v718_v25 }
  0xa3   : > { %1101 = shalt.err (!%p1098_p13)
}
  0xa4   : > { %880 = dma.vmem_to_hbm [thread:$0]  (%p1239_p9), %s735_s24, 32, %s737_s5, %s721_s23  }
  0xa5 PF: > { %s748_s8 = sand.u32 1, %s1140_s14   ;;  %p890_p0 = pnand %p849_p12, %p1246_p11 }
  0xa6   : > { %s749_s30 = scalar_lea.sflag [#allocation5], %s748_s8 }
  0xa7   : > { %p891_p1 = pneg %p890_p0 }
  0xa9   : > { %1135 = dma.done.wait (%p891_p1), %s749_s30, 32  }
  0xaa   : > { %1137 = vsyncadd (%p891_p1), %s749_s30, 4294967264  ;;  %s23_s19 = sadd.s32 1, %s1160_s19   ;;  %s1786_s14 = smov %s1144_s15 }
  0xab   : > { %p20_p2 = scmp.ge.s32.totalorder %s23_s19, 4   ;;  %s1787_s15 = smov %s1148_s16 }
  0xac   : > { %s1788_s16 = smov %s1244_s27  ;;  %s1789_s17 = smov %s1156_s18 }
  0xad   : > { %s1790_s18 = smov %s1792_s21  ;;  %22 = sbr.rel (!%p20_p2) target bundleno = 10 (0xa), region = 94 }
  0xb2   :  { %755 = vsyncpa [#allocation4], 1 }
  0xb3   :  { %757 = vsyncpa [#allocation4 + $0x1], 1 }
  0xb4   :  { %758 = vsyncpa [#allocation7], 1 }
  0xb5   :  { %760 = vsyncpa [#allocation7 + $0x1], 1 }
  0xb6   :  { %761 = vsyncpa [#allocation5], 1 }
  0xb7   :  { %763 = vsyncpa [#allocation5 + $0x1], 1 }

</bundles_post_ra>
